<compile_context>
chip_gen: v5e
topology: v5e:2x2
jax: 0.10.0
libtpu: 0.0.40
codegen_flags: <defaults>
</compile_context>

<pallas_src>
import jax
import jax.numpy as jnp
from jax.experimental import pallas as pl
from jax.experimental.pallas import tpu as pltpu

_NEG_MASK = -1e30  # masks padded class logits out of the softmax


def mlp_kernel(x_ref, w1_ref, b1_ref, w2_ref, b2_ref, o_ref):
    # fc1 on the MXU (bf16 x bf16 -> f32 accumulate), bias + ReLU on the VPU in f32.
    h = jnp.dot(x_ref[...], w1_ref[...], preferred_element_type=jnp.float32)
    h = jnp.maximum(h + b1_ref[...], 0.0)                      # (TB, H_pad)

    # fc2 on the MXU; padded class columns carry bias -1e30 -> exp() == 0 below.
    z = jnp.dot(h.astype(w2_ref.dtype), w2_ref[...],
                preferred_element_type=jnp.float32)
    z = z + b2_ref[...]                                        # (TB, C_pad)

    # Numerically stable LogSoftmax over the lane-dense (padded) class dim.
    m = jnp.max(z, axis=-1, keepdims=True)
    lse = jnp.log(jnp.sum(jnp.exp(z - m), axis=-1, keepdims=True)) + m
    o_ref[...] = (z - lse).astype(o_ref.dtype)


def _round_up(n, m):
    return pl.cdiv(n, m) * m


def mlp_forward(x_nchw, w1, b1, w2, b2, *, batch_tile=None):
    """x_nchw: (B, C, H, W) float32.  Returns log-probabilities (B, num_classes)."""
    B = x_nchw.shape[0]
    x = x_nchw.reshape(B, -1)                 # x.view(x.size(0), -1)
    D = x.shape[1]
    H = w1.shape[1]
    C = w2.shape[1]

    # ---- choose an MXU-friendly batch tile ---------------------------------
    if batch_tile is None:
        batch_tile = min(256, B)              # MXU-native M on v6e/v7x
        if B >= 32:                           # >=2 grid steps -> both v7x TCs busy
            batch_tile = min(batch_tile, pl.cdiv(B, 2))
    batch_tile = max(16, _round_up(batch_tile, 16))   # bf16 sublane packing
    B_pad = _round_up(B, batch_tile)

    # ---- pad operand dims to lane-dense multiples of 128 --------------------
    D_pad = _round_up(D, 128)                 # contraction dim of fc1
    H_pad = _round_up(H, 128)                 # fc1 output / fc2 contraction
    C_pad = _round_up(max(C, 128), 128)       # lane-dense fc2 / reductions / store

    # ---- pad / cast operands (all padding is semantics-preserving) ----------
    x_p = jnp.pad(x, ((0, B_pad - B), (0, D_pad - D))).astype(jnp.bfloat16)
    w1_b = jnp.pad(w1, ((0, D_pad - D), (0, H_pad - H))).astype(jnp.bfloat16)
    b1_2d = jnp.pad(b1.astype(jnp.float32), (0, H_pad - H)).reshape(1, H_pad)
    w2_b = jnp.pad(w2, ((0, H_pad - H), (0, C_pad - C))).astype(jnp.bfloat16)
    b2_2d = jnp.pad(b2.astype(jnp.float32), (0, C_pad - C),
                    constant_values=_NEG_MASK).reshape(1, C_pad)

    grid = (B_pad // batch_tile,)

    cost = pl.CostEstimate(
        flops=2 * B_pad * D_pad * H_pad + 2 * B_pad * H_pad * C_pad,
        transcendentals=B_pad * C_pad,        # exp in the softmax
        bytes_accessed=(x_p.size * 2 + w1_b.size * 2 + w2_b.size * 2
                        + b1_2d.size * 4 + b2_2d.size * 4 + B_pad * C_pad * 4),
    )

    out = pl.pallas_call(
        mlp_kernel,
        out_shape=jax.ShapeDtypeStruct((B_pad, C_pad), jnp.float32),
        grid_spec=pltpu.PrefetchScalarGridSpec(
            num_scalar_prefetch=0,
            grid=grid,
            in_specs=[
                pl.BlockSpec((batch_tile, D_pad), lambda i: (i, 0)),  # x tile (bf16)
                pl.BlockSpec((D_pad, H_pad), lambda i: (0, 0)),       # W1 (resident)
                pl.BlockSpec((1, H_pad), lambda i: (0, 0)),           # b1 (f32)
                pl.BlockSpec((H_pad, C_pad), lambda i: (0, 0)),       # W2 (resident)
                pl.BlockSpec((1, C_pad), lambda i: (0, 0)),           # b2 (mask pad)
            ],
            out_specs=pl.BlockSpec((batch_tile, C_pad), lambda i: (i, 0)),
        ),
        compiler_params=pltpu.CompilerParams(
            dimension_semantics=("parallel",),
            vmem_limit_bytes=48 * 1024 * 1024,
        ),
        cost_estimate=cost,
    )(x_p, w1_b, b1_2d, w2_b, b2_2d)

    return out[:B, :C]


def mlp_reference(x_nchw, w1, b1, w2, b2):
    # Same math as the kernel (bf16 MXU operands, f32 accumulate/epilogue) in JAX.
    x = x_nchw.reshape(x_nchw.shape[0], -1).astype(jnp.bfloat16)
    h = jnp.dot(x, w1.astype(jnp.bfloat16),
                preferred_element_type=jnp.float32) + b1
    h = jnp.maximum(h, 0.0)
    z = jnp.dot(h.astype(jnp.bfloat16), w2.astype(jnp.bfloat16),
                preferred_element_type=jnp.float32) + b2
    return jax.nn.log_softmax(z, axis=1)


if __name__ == "__main__":
    # Small shapes consistent with the module: flattened 28x28x3 images
    # (input_size = 2352, exercising the non-128-multiple D path), one hidden
    # layer, num_classes = 10.
    batch, chan, spatial = 16, 3, 28          # input_size = 3*28*28 = 2352
    input_size = chan * spatial * spatial
    hidden_size = 64
    num_classes = 10

    key = jax.random.PRNGKey(0)
    kx, k1, kb1, k2, kb2 = jax.random.split(key, 5)

    x = jax.random.normal(kx, (batch, chan, spatial, spatial), dtype=jnp.float32)

    # Deterministic parameter init (PyTorch Linear-style uniform bounds).
    bound1 = 1.0 / (input_size ** 0.5)
    w1 = jax.random.uniform(k1, (input_size, hidden_size), jnp.float32,
                            -bound1, bound1)
    b1 = jax.random.uniform(kb1, (hidden_size,), jnp.float32, -bound1, bound1)
    bound2 = 1.0 / (hidden_size ** 0.5)
    w2 = jax.random.uniform(k2, (hidden_size, num_classes), jnp.float32,
                            -bound2, bound2)
    b2 = jax.random.uniform(kb2, (num_classes,), jnp.float32, -bound2, bound2)

    out = jax.jit(mlp_forward)(x, w1, b1, w2, b2)
    out = jax.block_until_ready(out)

    ref = mlp_reference(x, w1, b1, w2, b2)
    assert out.shape == (batch, num_classes)
    assert bool(jnp.isfinite(out).all()), "non-finite output"
    assert jnp.allclose(out, ref, atol=2e-3, rtol=2e-3), "mismatch vs reference"

    print("KERNEL_OK")
</pallas_src>

<mosaic_0001>
module attributes {stable_mosaic.version = 11 : i64} {
  func.func @mlp_kernel(%arg0: i32, %arg1: memref<16x2432xbf16, #tpu.memory_space<vmem>>, %arg2: memref<2432x128xbf16, #tpu.memory_space<vmem>>, %arg3: memref<1x128xf32, #tpu.memory_space<vmem>>, %arg4: memref<128x128xbf16, #tpu.memory_space<vmem>>, %arg5: memref<1x128xf32, #tpu.memory_space<vmem>>, %arg6: memref<16x128xf32, #tpu.memory_space<vmem>>) attributes {dimension_semantics = [#tpu.dimension_semantics<parallel>], iteration_bounds = array<i64: 1>, scalar_prefetch = 0 : i64, scratch_operands = 0 : i64, tpu.core_type = #tpu.core_type<tc>, window_params = [{transform_indices = @transform_0, window_bounds = array<i64: 16, 2432>}, {pipeline_mode = #tpu.pipeline_mode<synchronous>, transform_indices = @transform_1, window_bounds = array<i64: 2432, 128>}, {pipeline_mode = #tpu.pipeline_mode<synchronous>, transform_indices = @transform_2, window_bounds = array<i64: 1, 128>}, {pipeline_mode = #tpu.pipeline_mode<synchronous>, transform_indices = @transform_3, window_bounds = array<i64: 128, 128>}, {pipeline_mode = #tpu.pipeline_mode<synchronous>, transform_indices = @transform_4, window_bounds = array<i64: 1, 128>}, {transform_indices = @transform_5, window_bounds = array<i64: 16, 128>}]} {
    %c0 = arith.constant 0 : index
    %c0_0 = arith.constant 0 : index
    %0 = vector.load %arg1[%c0, %c0_0] : memref<16x2432xbf16, #tpu.memory_space<vmem>>, vector<16x2432xbf16>
    %c0_1 = arith.constant 0 : index
    %c0_2 = arith.constant 0 : index
    %1 = vector.load %arg2[%c0_1, %c0_2] : memref<2432x128xbf16, #tpu.memory_space<vmem>>, vector<2432x128xbf16>
    %cst = arith.constant dense<0.000000e+00> : vector<16x128xf32>
    %2 = tpu.matmul %0, %1, %cst {dimension_numbers = #tpu.dot_dimension_numbers<[1], [0], [0], [1], [0, 0, 1, 1], [], []>} : vector<16x2432xbf16>, vector<2432x128xbf16>, vector<16x128xf32> -> vector<16x128xf32>
    %c0_3 = arith.constant 0 : index
    %c0_4 = arith.constant 0 : index
    %3 = vector.load %arg3[%c0_3, %c0_4] : memref<1x128xf32, #tpu.memory_space<vmem>>, vector<1x128xf32>
    %4 = vector.broadcast %3 : vector<1x128xf32> to vector<16x128xf32>
    %5 = arith.addf %2, %4 : vector<16x128xf32>
    %cst_5 = arith.constant 0.000000e+00 : f32
    %6 = vector.broadcast %cst_5 : f32 to vector<16x128xf32>
    %7 = arith.maximumf %5, %6 : vector<16x128xf32>
    %8 = arith.truncf %7 : vector<16x128xf32> to vector<16x128xbf16>
    %c0_6 = arith.constant 0 : index
    %c0_7 = arith.constant 0 : index
    %9 = vector.load %arg4[%c0_6, %c0_7] : memref<128x128xbf16, #tpu.memory_space<vmem>>, vector<128x128xbf16>
    %cst_8 = arith.constant dense<0.000000e+00> : vector<16x128xf32>
    %10 = tpu.matmul %8, %9, %cst_8 {dimension_numbers = #tpu.dot_dimension_numbers<[1], [0], [0], [1], [0, 0, 1, 1], [], []>} : vector<16x128xbf16>, vector<128x128xbf16>, vector<16x128xf32> -> vector<16x128xf32>
    %c0_9 = arith.constant 0 : index
    %c0_10 = arith.constant 0 : index
    %11 = vector.load %arg5[%c0_9, %c0_10] : memref<1x128xf32, #tpu.memory_space<vmem>>, vector<1x128xf32>
    %12 = vector.broadcast %11 : vector<1x128xf32> to vector<16x128xf32>
    %13 = arith.addf %10, %12 : vector<16x128xf32>
    %cst_11 = arith.constant dense<0xFF800000> : vector<16xf32>
    %14 = vector.multi_reduction <maximumf>, %13, %cst_11 [1] : vector<16x128xf32> to vector<16xf32>
    %15 = vector.shape_cast %14 : vector<16xf32> to vector<16x1xf32>
    %16 = vector.broadcast %15 : vector<16x1xf32> to vector<16x128xf32>
    %17 = arith.subf %13, %16 : vector<16x128xf32>
    %18 = math.exp %17 : vector<16x128xf32>
    %cst_12 = arith.constant dense<0.000000e+00> : vector<16xf32>
    %19 = vector.multi_reduction <add>, %18, %cst_12 [1] : vector<16x128xf32> to vector<16xf32>
    %20 = vector.shape_cast %19 : vector<16xf32> to vector<16x1xf32>
    %21 = math.log %20 : vector<16x1xf32>
    %22 = arith.addf %21, %15 : vector<16x1xf32>
    %23 = vector.broadcast %22 : vector<16x1xf32> to vector<16x128xf32>
    %24 = arith.subf %13, %23 : vector<16x128xf32>
    %c0_13 = arith.constant 0 : index
    %c0_14 = arith.constant 0 : index
    %25 = vector.load %arg6[%c0_13, %c0_14] : memref<16x128xf32, #tpu.memory_space<vmem>>, vector<16x128xf32>
    tpu.vector_store %arg6[%c0_13, %c0_14], %24 {strides = array<i32>} : memref<16x128xf32, #tpu.memory_space<vmem>>, vector<16x128xf32>,
    return
  }
  func.func @transform_0(%arg0: i32) -> (i32, i32) {
    %c0_i32 = arith.constant 0 : i32
    %c0_i32_0 = arith.constant 0 : i32
    return %arg0, %c0_i32 : i32, i32
  }
  func.func @transform_1(%arg0: i32) -> (i32, i32) {
    %c0_i32 = arith.constant 0 : i32
    %c0_i32_0 = arith.constant 0 : i32
    %c0_i32_1 = arith.constant 0 : i32
    return %c0_i32, %c0_i32_0 : i32, i32
  }
  func.func @transform_2(%arg0: i32) -> (i32, i32) {
    %c0_i32 = arith.constant 0 : i32
    %c0_i32_0 = arith.constant 0 : i32
    %c0_i32_1 = arith.constant 0 : i32
    return %c0_i32, %c0_i32_0 : i32, i32
  }
  func.func @transform_3(%arg0: i32) -> (i32, i32) {
    %c0_i32 = arith.constant 0 : i32
    %c0_i32_0 = arith.constant 0 : i32
    %c0_i32_1 = arith.constant 0 : i32
    return %c0_i32, %c0_i32_0 : i32, i32
  }
  func.func @transform_4(%arg0: i32) -> (i32, i32) {
    %c0_i32 = arith.constant 0 : i32
    %c0_i32_0 = arith.constant 0 : i32
    %c0_i32_1 = arith.constant 0 : i32
    return %c0_i32, %c0_i32_0 : i32, i32
  }
  func.func @transform_5(%arg0: i32) -> (i32, i32) {
    %c0_i32 = arith.constant 0 : i32
    %c0_i32_0 = arith.constant 0 : i32
    return %arg0, %c0_i32 : i32, i32
  }
}

</mosaic_0001>

<bundles_post_ra>
// kernel: mlp_forward.1
= control target key start
LH: loop header
LB: loop body
LE: loop exit
PB: predicated region body
PF: predicated region fallthrough
CT: control target
= control target key end

     0   :  { %s3320_s0 = inlined_call_operand.vmem [shape: bf16[16,2432], index: 0, kind: input, shape index: {}]   ;;  %s3321_s1 = inlined_call_operand.vmem [shape: bf16[2432,128], index: 1, kind: input, shape index: {}]   ;;  %s3322_s2 = inlined_call_operand.vmem [shape: f32[1,128], index: 2, kind: input, shape index: {}]   ;;  %s3323_s3 = inlined_call_operand.vmem [shape: bf16[128,128], index: 3, kind: input, shape index: {}]   ;;  %s3324_s4 = inlined_call_operand.vmem [shape: f32[1,128], index: 4, kind: input, shape index: {}]   ;;  %s3325_s5 = inlined_call_operand.hbm [shape: f32[16,128], index: 5, kind: output, shape index: {}]  }
   0x1   :  { %v2492_v0 = vld [vmem:[%s3321_s1 + $0x38] sm:$0xff]  ;;  %v2491_v4 = vld [vmem:[%s3321_s1 + $0x30] sm:$0xff]  ;;  %v2490_v8 = vld [vmem:[%s3321_s1 + $0x28] sm:$0xff] }
   0x2   :  { %v2500_v1 = vld [vmem:[%s3321_s1 + $0x78] sm:$0xff]  ;;  %1357 = vmatpush.bf16.msra.mxu0 %v2492_v0  ;;  %v2499_v5 = vld [vmem:[%s3321_s1 + $0x70] sm:$0xff]  ;;  %v2498_v9 = vld [vmem:[%s3321_s1 + $0x68] sm:$0xff] }
   0x3   :  { %v2508_v2 = vld [vmem:[%s3321_s1 + $0xb8] sm:$0xff]  ;;  %1371 = vmatpush.bf16.msra.mxu1 %v2500_v1  ;;  %v2507_v6 = vld [vmem:[%s3321_s1 + $0xb0] sm:$0xff]  ;;  %v2506_v10 = vld [vmem:[%s3321_s1 + $0xa8] sm:$0xff] }
   0x4   :  { %v2516_v3 = vld [vmem:[%s3321_s1 + $0xf8] sm:$0xff]  ;;  %1385 = vmatpush.bf16.msra.mxu2 %v2508_v2  ;;  %v2515_v7 = vld [vmem:[%s3321_s1 + $0xf0] sm:$0xff]  ;;  %v2514_v11 = vld [vmem:[%s3321_s1 + $0xe8] sm:$0xff] }
   0x5   :  { %1399 = vmatpush.bf16.msra.mxu3 %v2516_v3  ;;  %v2489_v12 = vld [vmem:[%s3321_s1 + $0x20] sm:$0xff]  ;;  %v2488_v16 = vld [vmem:[%s3321_s1 + $0x18] sm:$0xff]  ;;  %v2487_v20 = vld [vmem:[%s3321_s1 + $0x10] sm:$0xff] }
   0x6   :  { %1358 = vmatpush.bf16.msra.mxu0 %v2491_v4  ;;  %v2497_v13 = vld [vmem:[%s3321_s1 + $0x60] sm:$0xff]  ;;  %v2496_v17 = vld [vmem:[%s3321_s1 + $0x58] sm:$0xff]  ;;  %v2495_v21 = vld [vmem:[%s3321_s1 + $0x50] sm:$0xff] }
   0x7   :  { %1372 = vmatpush.bf16.msra.mxu1 %v2499_v5  ;;  %v2505_v14 = vld [vmem:[%s3321_s1 + $0xa0] sm:$0xff]  ;;  %v2504_v18 = vld [vmem:[%s3321_s1 + $0x98] sm:$0xff]  ;;  %v2503_v22 = vld [vmem:[%s3321_s1 + $0x90] sm:$0xff] }
   0x8   :  { %1386 = vmatpush.bf16.msra.mxu2 %v2507_v6  ;;  %v2513_v15 = vld [vmem:[%s3321_s1 + $0xe0] sm:$0xff]  ;;  %v2512_v19 = vld [vmem:[%s3321_s1 + $0xd8] sm:$0xff]  ;;  %v2511_v23 = vld [vmem:[%s3321_s1 + $0xd0] sm:$0xff] }
   0x9   :  { %1400 = vmatpush.bf16.msra.mxu3 %v2515_v7  ;;  %v2486_v24 = vld [vmem:[%s3321_s1 + $0x8] sm:$0xff] }
   0xa   :  { %1359 = vmatpush.bf16.msra.mxu0 %v2490_v8  ;;  %v2494_v25 = vld [vmem:[%s3321_s1 + $0x48] sm:$0xff] }
   0xb   :  { %1373 = vmatpush.bf16.msra.mxu1 %v2498_v9  ;;  %v2502_v26 = vld [vmem:[%s3321_s1 + $0x88] sm:$0xff] }
   0xc   :  { %1387 = vmatpush.bf16.msra.mxu2 %v2506_v10  ;;  %v2510_v27 = vld [vmem:[%s3321_s1 + $0xc8] sm:$0xff] }
   0xd   :  { %1401 = vmatpush.bf16.msra.mxu3 %v2514_v11 }
   0xe   :  { %1360 = vmatpush.bf16.msra.mxu0 %v2489_v12 }
   0xf   :  { %1374 = vmatpush.bf16.msra.mxu1 %v2497_v13 }
  0x10   :  { %1388 = vmatpush.bf16.msra.mxu2 %v2505_v14 }
  0x11   :  { %1402 = vmatpush.bf16.msra.mxu3 %v2513_v15 }
  0x12   :  { %1361 = vmatpush.bf16.msra.mxu0 %v2488_v16 }
  0x13   :  { %1375 = vmatpush.bf16.msra.mxu1 %v2496_v17 }
  0x14   :  { %1389 = vmatpush.bf16.msra.mxu2 %v2504_v18 }
  0x15   :  { %1403 = vmatpush.bf16.msra.mxu3 %v2512_v19 }
  0x16   :  { %1362 = vmatpush.bf16.msra.mxu0 %v2487_v20 }
  0x17   :  { %1376 = vmatpush.bf16.msra.mxu1 %v2495_v21 }
  0x18   :  { %1390 = vmatpush.bf16.msra.mxu2 %v2503_v22 }
  0x19   :  { %1404 = vmatpush.bf16.msra.mxu3 %v2511_v23 }
  0x1a   :  { %10 = vsyncpa [#allocation3], 0  ;;  %v2485_v28 = vld [vmem:[%s3321_s1] sm:$0xff]  ;;  %1363 = vmatpush.bf16.msra.mxu0 %v2486_v24  ;;  %v2524_v31 = vld [vmem:[%s3321_s1 + $0x138] sm:$0xff]  ;;  %s1738_s17 = sshll.u32 %s3325_s5, 4  ;;  %s2685_s18 = smov 128   ;;  %s1739_s17 = int_to_ptr.hbm [resolvable:$true] %s1738_s17 }
  0x1b   :  { %v2493_v29 = vld [vmem:[%s3321_s1 + $0x40] sm:$0xff]  ;;  %1377 = vmatpush.bf16.msra.mxu1 %v2494_v25  ;;  %v2475_v33 = vld [vmem:[%s3320_s0 + $0x48] sm:$0xf0]  ;;  %v2532_v34 = vld [vmem:[%s3321_s1 + $0x178] sm:$0xff] }
  0x1c   :  { %v2501_v30 = vld [vmem:[%s3321_s1 + $0x80] sm:$0xff]  ;;  %1391 = vmatpush.bf16.msra.mxu2 %v2502_v26  ;;  %v1760_v35 = vld [vmem:[%s3320_s0 + $0x8] sm:$0xf]  ;;  %v2476_v36 = vld [vmem:[%s3320_s0 + $0x50] sm:$0xf0] }
  0x1d   :  { %v1752_v32 = vld [vmem:[%s3320_s0] sm:$0xf]  ;;  %1405 = vmatpush.bf16.msra.mxu3 %v2510_v27  ;;  %v2540_v37 = vld [vmem:[%s3321_s1 + $0x1b8] sm:$0xff]  ;;  %v2466_v38 = vld [vmem:[%s3320_s0 + $0x4] sm:$0xf]  ;;  %v1761_v43 = vor.u32 %v2476_v36, %v1760_v35 }
  0x1e   :  { %v1754_v39 = vld [vmem:[%s3320_s0 + $0x4c] sm:$0xf0]  ;;  %v2509_v40 = vld [vmem:[%s3321_s1 + $0xc0] sm:$0xff]  ;;  %v1753_v41 = vor.u32 %v2475_v33, %v1752_v32  ;;  %1364 = vmatpush.bf16.msra.mxu0 %v2485_v28  ;;  %v2548_v42 = vld [vmem:[%s3321_s1 + $0x1f8] sm:$0xff] }
  0x1f   :  { %1378 = vmatpush.bf16.msra.mxu1 %v2493_v29  ;;  %v2467_v44 = vld [vmem:[%s3320_s0 + $0xc] sm:$0xf]  ;;  %v1762_v45 = vld [vmem:[%s3320_s0 + $0x54] sm:$0xf0]  ;;  %v2523_v46 = vld [vmem:[%s3321_s1 + $0x130] sm:$0xff]  ;;  %v1757_v47 = vor.u32 %v2466_v38, %v1754_v39 }
  0x20   :  { %1392 = vmatpush.bf16.msra.mxu2 %v2501_v30  ;;  %v2531_v48 = vld [vmem:[%s3321_s1 + $0x170] sm:$0xff]  ;;  %v1765_v50 = vor.u32 %v2467_v44, %v1762_v45  ;;  %v2522_v52 = vld [vmem:[%s3321_s1 + $0x128] sm:$0xff]  ;;  %v2521_v56 = vld [vmem:[%s3321_s1 + $0x120] sm:$0xff] }
  0x21   :  { %v2539_v49 = vld [vmem:[%s3321_s1 + $0x1b0] sm:$0xff]  ;;  %1406 = vmatpush.bf16.msra.mxu3 %v2509_v40  ;;  %1365 = vmatmul.bf16.vlgmr.msra.gmra.mxu0 %v1753_v41  ;;  %v2530_v53 = vld [vmem:[%s3321_s1 + $0x168] sm:$0xff]  ;;  %v2529_v57 = vld [vmem:[%s3321_s1 + $0x160] sm:$0xff] }
  0x22   :  { %1413 = vmatpush.bf16.msrb.mxu0 %v2524_v31  ;;  %v2547_v51 = vld [vmem:[%s3321_s1 + $0x1f0] sm:$0xff]  ;;  %1379 = vmatmul.bf16.vlgmr.msra.gmra.mxu1 %v1757_v47  ;;  %v2538_v54 = vld [vmem:[%s3321_s1 + $0x1a8] sm:$0xff]  ;;  %v2537_v58 = vld [vmem:[%s3321_s1 + $0x1a0] sm:$0xff] }
  0x23   :  { %1427 = vmatpush.bf16.msrb.mxu1 %v2532_v34  ;;  %1393 = vmatmul.bf16.vlgmr.msra.gmra.mxu2 %v1761_v43  ;;  %v2546_v55 = vld [vmem:[%s3321_s1 + $0x1e8] sm:$0xff]  ;;  %v2545_v59 = vld [vmem:[%s3321_s1 + $0x1e0] sm:$0xff]  ;;  %v2520_v60 = vld [vmem:[%s3321_s1 + $0x118] sm:$0xff] }
  0x24   :  { %1441 = vmatpush.bf16.msrb.mxu2 %v2540_v37  ;;  %1407 = vmatmul.bf16.vlgmr.msra.gmra.mxu3 %v1765_v50  ;;  %v2528_v61 = vld [vmem:[%s3321_s1 + $0x158] sm:$0xff]  ;;  %v2519_v0 = vld [vmem:[%s3321_s1 + $0x110] sm:$0xff]  ;;  %v2518_v4 = vld [vmem:[%s3321_s1 + $0x108] sm:$0xff] }
  0x25   :  { %1455 = vmatpush.bf16.msrb.mxu3 %v2548_v42  ;;  %v2536_v62 = vld [vmem:[%s3321_s1 + $0x198] sm:$0xff]  ;;  %v2527_v1 = vld [vmem:[%s3321_s1 + $0x150] sm:$0xff]  ;;  %v2526_v5 = vld [vmem:[%s3321_s1 + $0x148] sm:$0xff] }
  0x26   :  { %1414 = vmatpush.bf16.msrb.mxu0 %v2523_v46  ;;  %v2544_v63 = vld [vmem:[%s3321_s1 + $0x1d8] sm:$0xff]  ;;  %v2535_v2 = vld [vmem:[%s3321_s1 + $0x190] sm:$0xff]  ;;  %v2534_v6 = vld [vmem:[%s3321_s1 + $0x188] sm:$0xff] }
  0x27   :  { %1428 = vmatpush.bf16.msrb.mxu1 %v2531_v48  ;;  %v2543_v3 = vld [vmem:[%s3321_s1 + $0x1d0] sm:$0xff]  ;;  %v2542_v7 = vld [vmem:[%s3321_s1 + $0x1c8] sm:$0xff]  ;;  %v2517_v8 = vld [vmem:[%s3321_s1 + $0x100] sm:$0xff] }
  0x28   :  { %1442 = vmatpush.bf16.msrb.mxu2 %v2539_v49  ;;  %v2525_v9 = vld [vmem:[%s3321_s1 + $0x140] sm:$0xff]  ;;  %v2556_v11 = vld [vmem:[%s3321_s1 + $0x238] sm:$0xff]  ;;  %v1768_v13 = vld [vmem:[%s3320_s0 + $0x10] sm:$0xf] }
  0x29   :  { %1456 = vmatpush.bf16.msrb.mxu3 %v2547_v51  ;;  %v2533_v10 = vld [vmem:[%s3321_s1 + $0x180] sm:$0xff]  ;;  %v2564_v12 = vld [vmem:[%s3321_s1 + $0x278] sm:$0xff]  ;;  %v2468_v18 = vld [vmem:[%s3320_s0 + $0x14] sm:$0xf] }
  0x2a   :  { %1415 = vmatpush.bf16.msrb.mxu0 %v2522_v52  ;;  %v2477_v14 = vld [vmem:[%s3320_s0 + $0x58] sm:$0xf0]  ;;  %v1776_v15 = vld [vmem:[%s3320_s0 + $0x18] sm:$0xf]  ;;  %v2478_v16 = vld [vmem:[%s3320_s0 + $0x60] sm:$0xf0] }
  0x2b   :  { %1429 = vmatpush.bf16.msrb.mxu1 %v2530_v53  ;;  %v2572_v17 = vld [vmem:[%s3321_s1 + $0x2b8] sm:$0xff]  ;;  %v1770_v19 = vld [vmem:[%s3320_s0 + $0x5c] sm:$0xf0]  ;;  %v1778_v22 = vld [vmem:[%s3320_s0 + $0x64] sm:$0xf0]  ;;  %v1769_v23 = vor.u32 %v2477_v14, %v1768_v13  ;;  %v1777_v24 = vor.u32 %v2478_v16, %v1776_v15 }
  0x2c   :  { %1443 = vmatpush.bf16.msrb.mxu2 %v2538_v54  ;;  %v2541_v20 = vld [vmem:[%s3321_s1 + $0x1c0] sm:$0xff]  ;;  %v2469_v21 = vld [vmem:[%s3320_s0 + $0x1c] sm:$0xf]  ;;  %v1773_v26 = vor.u32 %v2468_v18, %v1770_v19  ;;  %v2555_v28 = vld [vmem:[%s3321_s1 + $0x230] sm:$0xff] }
  0x2d   :  { %1457 = vmatpush.bf16.msrb.mxu3 %v2546_v55  ;;  %v2580_v25 = vld [vmem:[%s3321_s1 + $0x2f8] sm:$0xff]  ;;  %v1781_v27 = vor.u32 %v2469_v21, %v1778_v22  ;;  %v2563_v29 = vld [vmem:[%s3321_s1 + $0x270] sm:$0xff]  ;;  %v2554_v32 = vld [vmem:[%s3321_s1 + $0x228] sm:$0xff] }
  0x2e   :  { %1416 = vmatpush.bf16.msrb.mxu0 %v2521_v56  ;;  %v2571_v30 = vld [vmem:[%s3321_s1 + $0x2b0] sm:$0xff]  ;;  %v2562_v33 = vld [vmem:[%s3321_s1 + $0x268] sm:$0xff]  ;;  %v2553_v36 = vld [vmem:[%s3321_s1 + $0x220] sm:$0xff] }
  0x2f   :  { %1430 = vmatpush.bf16.msrb.mxu1 %v2529_v57  ;;  %v2579_v31 = vld [vmem:[%s3321_s1 + $0x2f0] sm:$0xff]  ;;  %v2570_v34 = vld [vmem:[%s3321_s1 + $0x2a8] sm:$0xff]  ;;  %v2561_v37 = vld [vmem:[%s3321_s1 + $0x260] sm:$0xff] }
  0x30   :  { %1444 = vmatpush.bf16.msrb.mxu2 %v2537_v58  ;;  %v2578_v35 = vld [vmem:[%s3321_s1 + $0x2e8] sm:$0xff]  ;;  %v2569_v38 = vld [vmem:[%s3321_s1 + $0x2a0] sm:$0xff]  ;;  %v2552_v40 = vld [vmem:[%s3321_s1 + $0x218] sm:$0xff] }
  0x31   :  { %1458 = vmatpush.bf16.msrb.mxu3 %v2545_v59  ;;  %v2577_v39 = vld [vmem:[%s3321_s1 + $0x2e0] sm:$0xff]  ;;  %v2560_v41 = vld [vmem:[%s3321_s1 + $0x258] sm:$0xff]  ;;  %v2551_v44 = vld [vmem:[%s3321_s1 + $0x210] sm:$0xff] }
  0x32   :  { %1417 = vmatpush.bf16.msrb.mxu0 %v2520_v60  ;;  %v2568_v42 = vld [vmem:[%s3321_s1 + $0x298] sm:$0xff]  ;;  %v2559_v45 = vld [vmem:[%s3321_s1 + $0x250] sm:$0xff]  ;;  %v2550_v48 = vld [vmem:[%s3321_s1 + $0x208] sm:$0xff] }
  0x33   :  { %1431 = vmatpush.bf16.msrb.mxu1 %v2528_v61  ;;  %v2576_v43 = vld [vmem:[%s3321_s1 + $0x2d8] sm:$0xff]  ;;  %v2567_v46 = vld [vmem:[%s3321_s1 + $0x290] sm:$0xff]  ;;  %v2558_v49 = vld [vmem:[%s3321_s1 + $0x248] sm:$0xff] }
  0x34   :  { %1445 = vmatpush.bf16.msrb.mxu2 %v2536_v62  ;;  %v2575_v47 = vld [vmem:[%s3321_s1 + $0x2d0] sm:$0xff]  ;;  %v2566_v50 = vld [vmem:[%s3321_s1 + $0x288] sm:$0xff]  ;;  %v2549_v52 = vld [vmem:[%s3321_s1 + $0x200] sm:$0xff] }
  0x35   :  { %1459 = vmatpush.bf16.msrb.mxu3 %v2544_v63  ;;  %v2574_v51 = vld [vmem:[%s3321_s1 + $0x2c8] sm:$0xff]  ;;  %v2557_v53 = vld [vmem:[%s3321_s1 + $0x240] sm:$0xff]  ;;  %v2588_v55 = vld [vmem:[%s3321_s1 + $0x338] sm:$0xff] }
  0x36   :  { %1418 = vmatpush.bf16.msrb.mxu0 %v2519_v0  ;;  %v2565_v54 = vld [vmem:[%s3321_s1 + $0x280] sm:$0xff]  ;;  %v2596_v56 = vld [vmem:[%s3321_s1 + $0x378] sm:$0xff]  ;;  %v2479_v58 = vld [vmem:[%s3320_s0 + $0x68] sm:$0xf0] }
  0x37   :  { %1432 = vmatpush.bf16.msrb.mxu1 %v2527_v1  ;;  %v1784_v57 = vld [vmem:[%s3320_s0 + $0x20] sm:$0xf]  ;;  %v1792_v59 = vld [vmem:[%s3320_s0 + $0x28] sm:$0xf]  ;;  %v2480_v60 = vld [vmem:[%s3320_s0 + $0x70] sm:$0xf0] }
  0x38   :  { %1446 = vmatpush.bf16.msrb.mxu2 %v2535_v2  ;;  %v2604_v61 = vld [vmem:[%s3321_s1 + $0x3b8] sm:$0xff]  ;;  %v2470_v62 = vld [vmem:[%s3320_s0 + $0x24] sm:$0xf]  ;;  %v1786_v63 = vld [vmem:[%s3320_s0 + $0x6c] sm:$0xf0] }
  0x39   :  { %1460 = vmatpush.bf16.msrb.mxu3 %v2543_v3  ;;  %v2573_v0 = vld [vmem:[%s3321_s1 + $0x2c0] sm:$0xff]  ;;  %v2471_v1 = vld [vmem:[%s3320_s0 + $0x2c] sm:$0xf]  ;;  %v1794_v2 = vld [vmem:[%s3320_s0 + $0x74] sm:$0xf0]  ;;  %v1785_v3 = vor.u32 %v2479_v58, %v1784_v57 }
  0x3a   :  { %1419 = vmatpush.bf16.msrb.mxu0 %v2518_v4  ;;  %v1793_v4 = vor.u32 %v2480_v60, %v1792_v59  ;;  %v2594_v13 = vld [vmem:[%s3321_s1 + $0x368] sm:$0xff]  ;;  %v2585_v16 = vld [vmem:[%s3321_s1 + $0x320] sm:$0xff]  ;;  %v2592_v21 = vld [vmem:[%s3321_s1 + $0x358] sm:$0xff] }
  0x3b   :  { %1433 = vmatpush.bf16.msrb.mxu1 %v2526_v5  ;;  %v2612_v5 = vld [vmem:[%s3321_s1 + $0x3f8] sm:$0xff]  ;;  %v2602_v14 = vld [vmem:[%s3321_s1 + $0x3a8] sm:$0xff]  ;;  %v2601_v18 = vld [vmem:[%s3321_s1 + $0x3a0] sm:$0xff] }
  0x3c   :  { %1447 = vmatpush.bf16.msrb.mxu2 %v2534_v6  ;;  %v1789_v6 = vor.u32 %v2470_v62, %v1786_v63  ;;  %v2610_v15 = vld [vmem:[%s3321_s1 + $0x3e8] sm:$0xff]  ;;  %v2609_v19 = vld [vmem:[%s3321_s1 + $0x3e0] sm:$0xff]  ;;  %v2600_v22 = vld [vmem:[%s3321_s1 + $0x398] sm:$0xff] }
  0x3d   :  { %1461 = vmatpush.bf16.msrb.mxu3 %v2542_v7  ;;  %v1797_v7 = vor.u32 %v2471_v1, %v1794_v2  ;;  %v2617_v57 = vld [vmem:[%s3321_s1 + $0x420] sm:$0xff]  ;;  %v2616_v60 = vld [vmem:[%s3321_s1 + $0x418] sm:$0xff]  ;;  %v2615_v63 = vld [vmem:[%s3321_s1 + $0x410] sm:$0xff] }
  0x3e   :  { %1420 = vmatpush.bf16.msrb.mxu0 %v2517_v8  ;;  %v2587_v8 = vld [vmem:[%s3321_s1 + $0x330] sm:$0xff]  ;;  %v2625_v58 = vld [vmem:[%s3321_s1 + $0x460] sm:$0xff]  ;;  %v2632_v62 = vld [vmem:[%s3321_s1 + $0x498] sm:$0xff] }
  0x3f   :  { %1434 = vmatpush.bf16.msrb.mxu1 %v2525_v9  ;;  %v2595_v9 = vld [vmem:[%s3321_s1 + $0x370] sm:$0xff]  ;;  %v2633_v59 = vld [vmem:[%s3321_s1 + $0x4a0] sm:$0xff]  ;;  %v2614_v2 = vld [vmem:[%s3321_s1 + $0x408] sm:$0xff] }
  0x40   :  { %1448 = vmatpush.bf16.msrb.mxu2 %v2533_v10  ;;  %v2603_v10 = vld [vmem:[%s3321_s1 + $0x3b0] sm:$0xff] }
  0x41   :  { %1462 = vmatpush.bf16.msrb.mxu3 %v2541_v20  ;;  %1421 = vmatmul.bf16.vlgmr.msrb.gmra.mxu0 %v1769_v23  ;;  %v2584_v20 = vld [vmem:[%s3321_s1 + $0x318] sm:$0xff]  ;;  %v2631_v1 = vld [vmem:[%s3321_s1 + $0x490] sm:$0xff] }
  0x42   :  { %1469 = vmatpush.bf16.msra.mxu0 %v2556_v11  ;;  %1435 = vmatmul.bf16.vlgmr.msrb.gmra.mxu1 %v1773_v26  ;;  %v2611_v11 = vld [vmem:[%s3321_s1 + $0x3f0] sm:$0xff]  ;;  %v2608_v23 = vld [vmem:[%s3321_s1 + $0x3d8] sm:$0xff] }
  0x43   :  { %1483 = vmatpush.bf16.msra.mxu1 %v2564_v12  ;;  %1449 = vmatmul.bf16.vlgmr.msrb.gmra.mxu2 %v1777_v24  ;;  %v2586_v12 = vld [vmem:[%s3321_s1 + $0x328] sm:$0xff]  ;;  %v2583_v24 = vld [vmem:[%s3321_s1 + $0x310] sm:$0xff] }
  0x44   :  { %1497 = vmatpush.bf16.msra.mxu2 %v2572_v17  ;;  %1463 = vmatmul.bf16.vlgmr.msrb.gmra.mxu3 %v1781_v27  ;;  %v2593_v17 = vld [vmem:[%s3321_s1 + $0x360] sm:$0xff]  ;;  %v2599_v26 = vld [vmem:[%s3321_s1 + $0x390] sm:$0xff] }
  0x45   :  { %1511 = vmatpush.bf16.msra.mxu3 %v2580_v25  ;;  %v2591_v25 = vld [vmem:[%s3321_s1 + $0x350] sm:$0xff] }
  0x46   :  { %1470 = vmatpush.bf16.msra.mxu0 %v2555_v28  ;;  %v2607_v27 = vld [vmem:[%s3321_s1 + $0x3d0] sm:$0xff]  ;;  %v2582_v28 = vld [vmem:[%s3321_s1 + $0x308] sm:$0xff] }
  0x47   :  { %1484 = vmatpush.bf16.msra.mxu1 %v2563_v29  ;;  %v2590_v29 = vld [vmem:[%s3321_s1 + $0x348] sm:$0xff] }
  0x48   :  { %1498 = vmatpush.bf16.msra.mxu2 %v2571_v30  ;;  %v2598_v30 = vld [vmem:[%s3321_s1 + $0x388] sm:$0xff] }
  0x49   :  { %1512 = vmatpush.bf16.msra.mxu3 %v2579_v31  ;;  %v2606_v31 = vld [vmem:[%s3321_s1 + $0x3c8] sm:$0xff] }
  0x4a   :  { %1471 = vmatpush.bf16.msra.mxu0 %v2554_v32  ;;  %v2581_v32 = vld [vmem:[%s3321_s1 + $0x300] sm:$0xff] }
  0x4b   :  { %1485 = vmatpush.bf16.msra.mxu1 %v2562_v33  ;;  %v2589_v33 = vld [vmem:[%s3321_s1 + $0x340] sm:$0xff] }
  0x4c   :  { %1499 = vmatpush.bf16.msra.mxu2 %v2570_v34  ;;  %v2597_v34 = vld [vmem:[%s3321_s1 + $0x380] sm:$0xff] }
  0x4d   :  { %1513 = vmatpush.bf16.msra.mxu3 %v2578_v35  ;;  %v2620_v35 = vld [vmem:[%s3321_s1 + $0x438] sm:$0xff] }
  0x4e   :  { %1472 = vmatpush.bf16.msra.mxu0 %v2553_v36  ;;  %v2628_v36 = vld [vmem:[%s3321_s1 + $0x478] sm:$0xff] }
  0x4f   :  { %1486 = vmatpush.bf16.msra.mxu1 %v2561_v37  ;;  %v1800_v37 = vld [vmem:[%s3320_s0 + $0x30] sm:$0xf] }
  0x50   :  { %1500 = vmatpush.bf16.msra.mxu2 %v2569_v38  ;;  %v2481_v38 = vld [vmem:[%s3320_s0 + $0x78] sm:$0xf0] }
  0x51   :  { %1514 = vmatpush.bf16.msra.mxu3 %v2577_v39  ;;  %v1808_v39 = vld [vmem:[%s3320_s0 + $0x38] sm:$0xf] }
  0x52   :  { %1473 = vmatpush.bf16.msra.mxu0 %v2552_v40  ;;  %v2482_v40 = vld [vmem:[%s3320_s0 + $0x80] sm:$0xf0] }
  0x53   :  { %1487 = vmatpush.bf16.msra.mxu1 %v2560_v41  ;;  %v2636_v41 = vld [vmem:[%s3321_s1 + $0x4b8] sm:$0xff] }
  0x54   :  { %1501 = vmatpush.bf16.msra.mxu2 %v2568_v42  ;;  %v2472_v42 = vld [vmem:[%s3320_s0 + $0x34] sm:$0xf] }
  0x55   :  { %1515 = vmatpush.bf16.msra.mxu3 %v2576_v43  ;;  %v1802_v43 = vld [vmem:[%s3320_s0 + $0x7c] sm:$0xf0] }
  0x56   :  { %1474 = vmatpush.bf16.msra.mxu0 %v2551_v44  ;;  %v2605_v44 = vld [vmem:[%s3321_s1 + $0x3c0] sm:$0xff] }
  0x57   :  { %1488 = vmatpush.bf16.msra.mxu1 %v2559_v45  ;;  %v2473_v45 = vld [vmem:[%s3320_s0 + $0x3c] sm:$0xf] }
  0x58   :  { %1502 = vmatpush.bf16.msra.mxu2 %v2567_v46  ;;  %v1810_v46 = vld [vmem:[%s3320_s0 + $0x84] sm:$0xf0] }
  0x59   :  { %1516 = vmatpush.bf16.msra.mxu3 %v2575_v47  ;;  %v1801_v47 = vor.u32 %v2481_v38, %v1800_v37 }
  0x5a   :  { %1475 = vmatpush.bf16.msra.mxu0 %v2550_v48  ;;  %v1809_v48 = vor.u32 %v2482_v40, %v1808_v39  ;;  %v2642_v39 = vld [vmem:[%s3323_s3 + $0x28] sm:$0xff] }
  0x5b   :  { %1489 = vmatpush.bf16.msra.mxu1 %v2558_v49  ;;  %v1805_v49 = vor.u32 %v2472_v42, %v1802_v43 }
  0x5c   :  { %1503 = vmatpush.bf16.msra.mxu2 %v2566_v50  ;;  %v1813_v50 = vor.u32 %v2473_v45, %v1810_v46  ;;  %v2641_v46 = vld [vmem:[%s3323_s3 + $0x20] sm:$0xff] }
  0x5d   :  { %1517 = vmatpush.bf16.msra.mxu3 %v2574_v51  ;;  %v2619_v51 = vld [vmem:[%s3321_s1 + $0x430] sm:$0xff] }
  0x5e   :  { %1476 = vmatpush.bf16.msra.mxu0 %v2549_v52  ;;  %v2627_v52 = vld [vmem:[%s3321_s1 + $0x470] sm:$0xff] }
  0x5f   :  { %1490 = vmatpush.bf16.msra.mxu1 %v2557_v53  ;;  %v2635_v53 = vld [vmem:[%s3321_s1 + $0x4b0] sm:$0xff] }
  0x60   :  { %1504 = vmatpush.bf16.msra.mxu2 %v2565_v54  ;;  %v2618_v54 = vld [vmem:[%s3321_s1 + $0x428] sm:$0xff] }
  0x61   :  { %1518 = vmatpush.bf16.msra.mxu3 %v2573_v0  ;;  %1477 = vmatmul.bf16.vlgmr.msra.gmra.mxu0 %v1785_v3  ;;  %v2623_v0 = vld [vmem:[%s3321_s1 + $0x450] sm:$0xff]  ;;  %v2622_v3 = vld [vmem:[%s3321_s1 + $0x448] sm:$0xff] }
  0x62   :  { %1525 = vmatpush.bf16.msrb.mxu0 %v2588_v55  ;;  %1491 = vmatmul.bf16.vlgmr.msra.gmra.mxu1 %v1789_v6  ;;  %v2626_v55 = vld [vmem:[%s3321_s1 + $0x468] sm:$0xff]  ;;  %v2621_v6 = vld [vmem:[%s3321_s1 + $0x440] sm:$0xff] }
  0x63   :  { %1539 = vmatpush.bf16.msrb.mxu1 %v2596_v56  ;;  %1505 = vmatmul.bf16.vlgmr.msra.gmra.mxu2 %v1793_v4  ;;  %v2634_v56 = vld [vmem:[%s3321_s1 + $0x4a8] sm:$0xff] }
  0x64   :  { %1553 = vmatpush.bf16.msrb.mxu2 %v2604_v61  ;;  %1519 = vmatmul.bf16.vlgmr.msra.gmra.mxu3 %v1797_v7  ;;  %v2624_v61 = vld [vmem:[%s3321_s1 + $0x458] sm:$0xff]  ;;  %v2630_v4 = vld [vmem:[%s3321_s1 + $0x488] sm:$0xff]  ;;  %v2629_v7 = vld [vmem:[%s3321_s1 + $0x480] sm:$0xff] }
  0x65   :  { %1567 = vmatpush.bf16.msrb.mxu3 %v2612_v5  ;;  %v2613_v5 = vld [vmem:[%s3321_s1 + $0x400] sm:$0xff]  ;;  %s2686_s1 = smov 8  }
  0x66   :  { %1526 = vmatpush.bf16.msrb.mxu0 %v2587_v8  ;;  %v1816_v8 = vld [vmem:[%s3320_s0 + $0x40] sm:$0xf] }
  0x67   :  { %1540 = vmatpush.bf16.msrb.mxu1 %v2595_v9  ;;  %v2483_v9 = vld [vmem:[%s3320_s0 + $0x88] sm:$0xf0] }
  0x68   :  { %1554 = vmatpush.bf16.msrb.mxu2 %v2603_v10  ;;  %v2474_v10 = vld [vmem:[%s3320_s0 + $0x44] sm:$0xf] }
  0x69   :  { %1568 = vmatpush.bf16.msrb.mxu3 %v2611_v11  ;;  %v1818_v11 = vld [vmem:[%s3320_s0 + $0x8c] sm:$0xf0] }
  0x6a   :  { %1527 = vmatpush.bf16.msrb.mxu0 %v2586_v12  ;;  %v1824_v12 = vld [vmem:[%s3320_s0 + $0x48] sm:$0xf] }
  0x6b   :  { %1541 = vmatpush.bf16.msrb.mxu1 %v2594_v13  ;;  %v2484_v13 = vld [vmem:[%s3320_s0 + $0x90] sm:$0xf0] }
  0x6c   :  { %1555 = vmatpush.bf16.msrb.mxu2 %v2602_v14  ;;  %v1817_v14 = vor.u32 %v2483_v9, %v1816_v8 }
  0x6d   :  { %1569 = vmatpush.bf16.msrb.mxu3 %v2610_v15  ;;  %v1821_v15 = vor.u32 %v2474_v10, %v1818_v11 }
  0x6e   :  { %1528 = vmatpush.bf16.msrb.mxu0 %v2585_v16  ;;  %v1825_v16 = vor.u32 %v2484_v13, %v1824_v12 }
  0x6f   :  { %1542 = vmatpush.bf16.msrb.mxu1 %v2593_v17 }
  0x70   :  { %1556 = vmatpush.bf16.msrb.mxu2 %v2601_v18 }
  0x71   :  { %1570 = vmatpush.bf16.msrb.mxu3 %v2609_v19 }
  0x72   :  { %1529 = vmatpush.bf16.msrb.mxu0 %v2584_v20 }
  0x73   :  { %1543 = vmatpush.bf16.msrb.mxu1 %v2592_v21 }
  0x74   :  { %1557 = vmatpush.bf16.msrb.mxu2 %v2600_v22 }
  0x75   :  { %1571 = vmatpush.bf16.msrb.mxu3 %v2608_v23 }
  0x76   :  { %1530 = vmatpush.bf16.msrb.mxu0 %v2583_v24 }
  0x77   :  { %1544 = vmatpush.bf16.msrb.mxu1 %v2591_v25 }
  0x78   :  { %1558 = vmatpush.bf16.msrb.mxu2 %v2599_v26 }
  0x79   :  { %1572 = vmatpush.bf16.msrb.mxu3 %v2607_v27  ;;  %v2648_v27 = vld [vmem:[%s3322_s2] ss:$0 sm:$0xff] }
  0x7a   :  { %1531 = vmatpush.bf16.msrb.mxu0 %v2582_v28 }
  0x7b   :  { %1545 = vmatpush.bf16.msrb.mxu1 %v2590_v29 }
  0x7c   :  { %1559 = vmatpush.bf16.msrb.mxu2 %v2598_v30 }
  0x7d   :  { %1573 = vmatpush.bf16.msrb.mxu3 %v2606_v31  ;;  %v2644_v31 = vld [vmem:[%s3323_s3 + $0x38] sm:$0xff] }
  0x7e   :  { %1532 = vmatpush.bf16.msrb.mxu0 %v2581_v32 }
  0x7f   :  { %1546 = vmatpush.bf16.msrb.mxu1 %v2589_v33 }
  0x80   :  { %1560 = vmatpush.bf16.msrb.mxu2 %v2597_v34  ;;  %v2643_v34 = vld [vmem:[%s3323_s3 + $0x30] sm:$0xff] }
  0x81   :  { %1574 = vmatpush.bf16.msrb.mxu3 %v2605_v44  ;;  %1533 = vmatmul.bf16.vlgmr.msrb.gmra.mxu0 %v1801_v47 }
  0x82   :  { %1581 = vmatpush.bf16.msra.mxu0 %v2620_v35  ;;  %1547 = vmatmul.bf16.vlgmr.msrb.gmra.mxu1 %v1805_v49 }
  0x83   :  { %1595 = vmatpush.bf16.msra.mxu1 %v2628_v36  ;;  %1561 = vmatmul.bf16.vlgmr.msrb.gmra.mxu2 %v1809_v48 }
  0x84   :  { %1609 = vmatpush.bf16.msra.mxu2 %v2636_v41  ;;  %1575 = vmatmul.bf16.vlgmr.msrb.gmra.mxu3 %v1813_v50  ;;  %v2640_v50 = vld [vmem:[%s3323_s3 + $0x18] sm:$0xff] }
  0x85   :  { %1694 = vmatpush.bf16.msra.mxu3 %v2644_v31 }
  0x86   :  { %1582 = vmatpush.bf16.msra.mxu0 %v2619_v51 }
  0x87   :  { %1596 = vmatpush.bf16.msra.mxu1 %v2627_v52 }
  0x88   :  { %1610 = vmatpush.bf16.msra.mxu2 %v2635_v53 }
  0x89   :  { %1695 = vmatpush.bf16.msra.mxu3 %v2643_v34 }
  0x8a   :  { %1583 = vmatpush.bf16.msra.mxu0 %v2618_v54 }
  0x8b   :  { %1597 = vmatpush.bf16.msra.mxu1 %v2626_v55 }
  0x8c   :  { %1611 = vmatpush.bf16.msra.mxu2 %v2634_v56  ;;  %v2639_v56 = vld [vmem:[%s3323_s3 + $0x10] sm:$0xff] }
  0x8d   :  { %1696 = vmatpush.bf16.msra.mxu3 %v2642_v39 }
  0x8e   :  { %1584 = vmatpush.bf16.msra.mxu0 %v2617_v57 }
  0x8f   :  { %1598 = vmatpush.bf16.msra.mxu1 %v2625_v58 }
  0x90   :  { %1612 = vmatpush.bf16.msra.mxu2 %v2633_v59 }
  0x91   :  { %1697 = vmatpush.bf16.msra.mxu3 %v2641_v46 }
  0x92   :  { %1585 = vmatpush.bf16.msra.mxu0 %v2616_v60 }
  0x93   :  { %1599 = vmatpush.bf16.msra.mxu1 %v2624_v61  ;;  %v2638_v61 = vld [vmem:[%s3323_s3 + $0x8] sm:$0xff] }
  0x94   :  { %1613 = vmatpush.bf16.msra.mxu2 %v2632_v62 }
  0x95   :  { %1698 = vmatpush.bf16.msra.mxu3 %v2640_v50 }
  0x96   :  { %1586 = vmatpush.bf16.msra.mxu0 %v2615_v63 }
  0x97   :  { %1600 = vmatpush.bf16.msra.mxu1 %v2623_v0 }
  0x98   :  { %1614 = vmatpush.bf16.msra.mxu2 %v2631_v1 }
  0x99   :  { %1699 = vmatpush.bf16.msra.mxu3 %v2639_v56 }
  0x9a   :  { %1587 = vmatpush.bf16.msra.mxu0 %v2614_v2 }
  0x9b   :  { %1601 = vmatpush.bf16.msra.mxu1 %v2622_v3  ;;  %v2637_v3 = vld [vmem:[%s3323_s3] sm:$0xff] }
  0x9c   :  { %1615 = vmatpush.bf16.msra.mxu2 %v2630_v4 }
  0x9d   :  { %1700 = vmatpush.bf16.msra.mxu3 %v2638_v61 }
  0x9e   :  { %1588 = vmatpush.bf16.msra.mxu0 %v2613_v5  ;;  %v1366_v17 = vpop.f32.mrf.mxu0 }
  0x9f   :  { %1602 = vmatpush.bf16.msra.mxu1 %v2621_v6  ;;  %v1380_v18 = vpop.f32.mrf.mxu1  ;;  %v1367_v29 = vadd.f32 %v2648_v27, %v1366_v17 }
  0xa0   :  { %1616 = vmatpush.bf16.msra.mxu2 %v2629_v7 }
  0xa1   :  { %1589 = vmatmul.bf16.vlgmr.msra.gmra.mxu0 %v1817_v14  ;;  %v1381_v32 = vadd.f32 %v1380_v18, %v1367_v29  ;;  %1701 = vmatpush.bf16.msra.mxu3 %v2637_v3 }
  0xa2   :  { %1603 = vmatmul.bf16.vlgmr.msra.gmra.mxu1 %v1821_v15 }
  0xa3   :  { %1617 = vmatmul.bf16.vlgmr.msra.gmra.mxu2 %v1825_v16 }
  0xa6   :  { %v1394_v19 = vpop.f32.mrf.mxu2  ;;  %v1368_v20 = vpop.f32.mrf.mxu0 }
  0xa7   :  { %v1408_v21 = vpop.f32.mrf.mxu3  ;;  %v1382_v22 = vpop.f32.mrf.mxu1  ;;  %v1369_v33 = vadd.f32 %v2648_v27, %v1368_v20  ;;  %v1395_v37 = vadd.f32 %v1394_v19, %v1381_v32 }
  0xa9   :  { %v1383_v38 = vadd.f32 %v1382_v22, %v1369_v33  ;;  %v1409_v42 = vadd.f32 %v1408_v21, %v1395_v37 }
  0xae   :  { %v1396_v23 = vpop.f32.mrf.mxu2 }
  0xaf   :  { %v1410_v25 = vpop.f32.mrf.mxu3  ;;  %v1397_v43 = vadd.f32 %v1396_v23, %v1383_v38 }
  0xb1   :  { %v1411_v47 = vadd.f32 %v1410_v25, %v1397_v43 }
  0xbe   :  { %v1422_v24 = vpop.f32.mrf.mxu0 }
  0xbf   :  { %v1436_v26 = vpop.f32.mrf.mxu1  ;;  %v1423_v48 = vadd.f32 %v1422_v24, %v1409_v42 }
  0xc1   :  { %v1437_v51 = vadd.f32 %v1436_v26, %v1423_v48 }
  0xc6   :  { %v1450_v28 = vpop.f32.mrf.mxu2  ;;  %v1424_v30 = vpop.f32.mrf.mxu0 }
  0xc7   :  { %v1464_v35 = vpop.f32.mrf.mxu3  ;;  %v1438_v36 = vpop.f32.mrf.mxu1  ;;  %v1425_v52 = vadd.f32 %v1424_v30, %v1411_v47  ;;  %v1451_v57 = vadd.f32 %v1450_v28, %v1437_v51 }
  0xc9   :  { %v1439_v58 = vadd.f32 %v1438_v36, %v1425_v52  ;;  %v1465_v62 = vadd.f32 %v1464_v35, %v1451_v57 }
  0xce   :  { %v1452_v40 = vpop.f32.mrf.mxu2 }
  0xcf   :  { %v1466_v45 = vpop.f32.mrf.mxu3  ;;  %v1453_v59 = vadd.f32 %v1452_v40, %v1439_v58 }
  0xd1   :  { %v1467_v0 = vadd.f32 %v1466_v45, %v1453_v59 }
  0xde   :  { %v1478_v41 = vpop.f32.mrf.mxu0 }
  0xdf   :  { %v1492_v44 = vpop.f32.mrf.mxu1  ;;  %v1479_v1 = vadd.f32 %v1478_v41, %v1465_v62  ;;  %v2649_v41 = vld [vmem:[%s3324_s4] ss:$0 sm:$0xff]  ;;  %s2684_s4 = smov [#allocation2]  }
  0xe0   :  { %s1736_s14 = sshll.u32 %s2684_s4, 4  ;;  %s1737_s14 = int_to_ptr.vmem [resolvable:$true] %s1736_s14 }
  0xe1   :  { %v1493_v6 = vadd.f32 %v1492_v44, %v1479_v1 }
  0xe6   :  { %v1506_v49 = vpop.f32.mrf.mxu2  ;;  %v1480_v53 = vpop.f32.mrf.mxu0 }
  0xe7   :  { %v1520_v54 = vpop.f32.mrf.mxu3  ;;  %v1494_v55 = vpop.f32.mrf.mxu1  ;;  %v1481_v4 = vadd.f32 %v1480_v53, %v1467_v0  ;;  %v1507_v8 = vadd.f32 %v1506_v49, %v1493_v6 }
  0xe9   :  { %v1495_v9 = vadd.f32 %v1494_v55, %v1481_v4  ;;  %v1521_v12 = vadd.f32 %v1520_v54, %v1507_v8 }
  0xee   :  { %v1508_v60 = vpop.f32.mrf.mxu2 }
  0xef   :  { %v1522_v5 = vpop.f32.mrf.mxu3  ;;  %v1509_v10 = vadd.f32 %v1508_v60, %v1495_v9 }
  0xf1   :  { %v1523_v15 = vadd.f32 %v1522_v5, %v1509_v10 }
  0xfe   :  { %v1534_v63 = vpop.f32.mrf.mxu0 }
  0xff   :  { %v1548_v2 = vpop.f32.mrf.mxu1  ;;  %v1535_v16 = vadd.f32 %v1534_v63, %v1521_v12 }
 0x101   :  { %v1549_v19 = vadd.f32 %v1548_v2, %v1535_v16 }
 0x106   :  { %v1562_v7 = vpop.f32.mrf.mxu2  ;;  %v1536_v11 = vpop.f32.mrf.mxu0 }
 0x107   :  { %v1576_v13 = vpop.f32.mrf.mxu3  ;;  %v1550_v14 = vpop.f32.mrf.mxu1  ;;  %v1537_v17 = vadd.f32 %v1536_v11, %v1523_v15  ;;  %v1563_v21 = vadd.f32 %v1562_v7, %v1549_v19 }
 0x109   :  { %v1551_v22 = vadd.f32 %v1550_v14, %v1537_v17  ;;  %v1577_v26 = vadd.f32 %v1576_v13, %v1563_v21 }
 0x10e   :  { %v1564_v18 = vpop.f32.mrf.mxu2 }
 0x10f   :  { %v1565_v24 = vadd.f32 %v1564_v18, %v1551_v22  ;;  %v1578_v25 = vpop.f32.mrf.mxu3 }
 0x111   :  { %v1579_v28 = vadd.f32 %v1578_v25, %v1565_v24 }
 0x11e   :  { %v1590_v20 = vpop.f32.mrf.mxu0 }
 0x11f   :  { %v1604_v23 = vpop.f32.mrf.mxu1  ;;  %v1591_v29 = vadd.f32 %v1590_v20, %v1577_v26 }
 0x121   :  { %v1605_v32 = vadd.f32 %v1604_v23, %v1591_v29 }
 0x126   :  { %v1618_v27 = vpop.f32.mrf.mxu2  ;;  %v1592_v30 = vpop.f32.mrf.mxu0 }
 0x127   :  { %v1593_v31 = vadd.f32 %v1592_v30, %v1579_v28  ;;  %v1606_v33 = vpop.f32.mrf.mxu1  ;;  %v1619_v34 = vadd.f32 %v1618_v27, %v1605_v32 }
 0x129   :  { %v1607_v35 = vadd.f32 %v1606_v33, %v1593_v31  ;;  %v1623_v38 = vmax.f32 %v1619_v34, 0.0 }
 0x12e   :  { %v1620_v36 = vpop.f32.mrf.mxu2 }
 0x12f   :  { %v1621_v37 = vadd.f32 %v1620_v36, %v1607_v35 }
 0x131   :  { %v1624_v39 = vmax.f32 %v1621_v37, 0.0 }
 0x133   :  { %v1625_v40 = vpack.c.bf16 %v1624_v39, %v1623_v38 }
 0x135   :  { %1702 = vmatmul.bf16.vlgmr.msra.gmra.mxu3 %v1625_v40 }
 0x1b8   :  { %v1703_v42 = vpop.f32.mrf.mxu3 }
 0x1b9   :  { %v1704_v43 = vadd.f32 %v2649_v41, %v1703_v42 }
 0x1bb   :  { %1708 = vmax.xlane.f32.xlu0 %v1704_v43 }
 0x1c0   :  { %v1705_v44 = vpop.f32.mrf.mxu3 }
 0x1c1   :  { %v1706_v45 = vadd.f32 %v2649_v41, %v1705_v44 }
 0x1c3   :  { %1710 = vmax.xlane.f32.xlu0 %v1706_v45 }
 0x22e   :  { %v1709_v46 = vpop.xlane.xlu0 %1708 }
 0x22f   :  { %v1712_v47 = vsub.f32 %v1704_v43, %v1709_v46 }
 0x231   :  { %v1714_v48 = vmul.f32 1.442695, %v1712_v47 }
 0x233   :  { %2650 = vpow2.f32 %v1714_v48 }
 0x236   :  { %v1711_v49 = vpop.xlane.xlu0 %1710 }
 0x237   :  { %v1713_v50 = vsub.f32 %v1706_v45, %v1711_v49 }
 0x239   :  { %v2651_v51 = vpop.eup %2650  ;;  %v1716_v52 = vmul.f32 1.442695, %v1713_v50 }
 0x23a   :  { %1718 = vadd.xlane.f32.xlu1 %v2651_v51 }
 0x23b   :  { %2652 = vpow2.f32 %v1716_v52 }
 0x241   :  { %v2653_v53 = vpop.eup %2652 }
 0x242   :  { %1720 = vadd.xlane.f32.xlu1 %v2653_v53 }
 0x2ad   :  { %v1719_v54 = vpop.xlane.xlu1 %1718 }
 0x2ae   :  { %2654 = vlog2.f32 %v1719_v54 }
 0x2b4   :  { %v2655_v55 = vpop.eup %2654 }
 0x2b5   :  { %v1723_v56 = vmul.f32 0.6931472, %v2655_v55  ;;  %v1721_v57 = vpop.xlane.xlu1 %1720 }
 0x2b6   :  { %2656 = vlog2.f32 %v1721_v57 }
 0x2b7   :  { %v1726_v58 = vadd.f32 %v1723_v56, %v1709_v46 }
 0x2b9   :  { %v1728_v59 = vsub.f32 %v1704_v43, %v1726_v58 }
 0x2bb   :  { %1730 = vst [vmem:[#allocation2] sm:$0xff] %v1728_v59 }
 0x2bc   :  { %v2657_v60 = vpop.eup %2656 }
 0x2bd   :  { %v1725_v61 = vmul.f32 0.6931472, %v2657_v60 }
 0x2bf   :  { %v1727_v62 = vadd.f32 %v1725_v61, %v1711_v49 }
 0x2c1   :  { %v1729_v63 = vsub.f32 %v1706_v45, %v1727_v62 }
 0x2c3   :  { %1731 = vst [vmem:[#allocation2 + $0x8] sm:$0xff] %v1729_v63 }
 0x2c4   :  { %1744 = dma.vmem_to_hbm [thread:$0]  %s1737_s14, 256, %s1739_s17, [#allocation3], %s2685_s18, %s2685_s18, %s2686_s1  }
 0x2c5   :  { %2682 = dma.done.wait [#allocation3], 256  }
 0x2c6   :  { %2683 = vsyncadd [#allocation3], 4294967040 }
 0x2c7   :  { %1749 = vsyncpa [#allocation3], 1 }

</bundles_post_ra>
